<compile_context>
chip_gen: v7x
topology: tpu7x:2x2x1
jax: 0.10.0
libtpu: 0.0.40
codegen_flags: <defaults>
</compile_context>

<pallas_src>
import functools

import numpy as np
import jax
import jax.numpy as jnp
from jax import lax
from jax.experimental import pallas as pl
from jax.experimental.pallas import tpu as pltpu


# --------------------------------------------------------------------------- #
# Interpolation weights (PyTorch bilinear, align_corners=False)
# --------------------------------------------------------------------------- #
def _interp_matrix(in_size: int, out_size: int) -> np.ndarray:
    """1-D bilinear interpolation matrix matching PyTorch align_corners=False."""
    out_idx = np.arange(out_size, dtype=np.float64)
    scale = in_size / out_size
    src = (out_idx + 0.5) * scale - 0.5
    src = np.maximum(src, 0.0)                       # PyTorch clamps negatives to 0
    i0 = np.floor(src).astype(np.int64)
    i0 = np.minimum(i0, in_size - 1)
    i1 = np.minimum(i0 + 1, in_size - 1)
    frac = src - i0
    W = np.zeros((out_size, in_size), dtype=np.float64)
    for o in range(out_size):
        W[o, i0[o]] += 1.0 - frac[o]
        W[o, i1[o]] += frac[o]
    return W.astype(np.float32)


def _round_up(n: int, m: int) -> int:
    return ((n + m - 1) // m) * m


# --------------------------------------------------------------------------- #
# Tiling choice: planes per grid step (must divide N*C -> no padding, no tail)
# --------------------------------------------------------------------------- #
def _choose_planes_per_step(BC: int, H: int, W: int,
                            in_isz: int, out_isz: int, vmem_cap: int) -> int:
    Hout, Wout = 2 * H, 2 * W
    per_plane_hbm = H * W * in_isz + Hout * Wout * out_isz
    # VMEM footprint of one plane inside the kernel blocks (lanes pad to 128).
    per_plane_vmem = H * (_round_up(W, 128) * in_isz
                          + _round_up(2 * Wout, 128) * out_isz)

    block_budget = min(48 * 1024 * 1024, vmem_cap // 3)   # in+out, single copy
    target_step_hbm = 8 * 1024 * 1024                     # amortize ~0.35us/step

    b_cap = max(1, block_budget // (2 * per_plane_vmem))  # x2: double buffering
    b_cap = min(b_cap, max(1, -(-target_step_hbm // per_plane_hbm)))
    # Keep >=4 grid steps only when there is plenty of work (v7x megacore +
    # pipelining); do NOT shrink the slab for small problems (v5e/v6e single TC).
    if BC * per_plane_hbm >= 4 * target_step_hbm:
        b_cap = min(b_cap, max(1, BC // 4))
    b_cap = max(1, min(BC, b_cap))

    # Largest divisor of BC (no pad, no tail) whose block is (8,*)-legal.
    for b in range(b_cap, 0, -1):
        if BC % b == 0 and (b == BC or (b * H) % 8 == 0):
            return b
    return BC   # fall back to a single full-array block (always legal)


# --------------------------------------------------------------------------- #
# Kernel
# --------------------------------------------------------------------------- #
def _upsample2x_kernel(x_ref, wwt_ref, o_ref, *, H: int, Wout: int):
    # x_ref  : (BH, W)        B planes' rows stacked along sublanes (NCHW view)
    # wwt_ref: (W, Wout)      column-interp weights (transposed)
    # o_ref  : (BH, 2*Wout)   lanes [0:Wout]  = even output rows (2*hi)
    #                         lanes [Wout: ]  = odd  output rows (2*hi+1)
    #                         -> a free reshape-view of (B, Hout, Wout)
    # Column (width) interpolation on the MXU, f32 accumulation.
    y = jnp.dot(x_ref[...], wwt_ref[...],
                preferred_element_type=jnp.float32)        # (BH, Wout) f32

    BH = y.shape[0]
    # Row (height) interpolation on the VPU: neighbours via sublane rolls.
    # Block row offsets are always multiples of H, so the circular wrap rows
    # are exactly the plane-top / plane-bottom rows, which get clamped anyway.
    y_up = pltpu.roll(y, shift=1, axis=0)                   # y_up[i] = y[i-1]
    y_dn = pltpu.roll(y, shift=BH - 1, axis=0)              # y_dn[i] = y[i+1]

    row = lax.broadcasted_iota(jnp.int32, (BH, 1), 0)
    if H & (H - 1) == 0:
        rip = row & (H - 1)                                 # row index within plane
    else:
        rip = row % H
    y_up = jnp.where(rip == 0, y, y_up)                     # clamp at plane top
    y_dn = jnp.where(rip == H - 1, y, y_dn)                 # clamp at plane bottom

    even = 0.75 * y + 0.25 * y_up                           # output rows 2*hi
    odd = 0.75 * y + 0.25 * y_dn                            # output rows 2*hi+1
    o_ref[:, :Wout] = even.astype(o_ref.dtype)
    o_ref[:, Wout:] = odd.astype(o_ref.dtype)


# --------------------------------------------------------------------------- #
# Wrapper
# --------------------------------------------------------------------------- #
def upsample_bilinear_2x(x: jax.Array, *, planes_per_step: int | None = None) -> jax.Array:
    """x: (N, C, H, W) -> (N, C, 2H, 2W), bilinear, align_corners=False."""
    N, C, H, W = x.shape
    Hout, Wout = 2 * H, 2 * W
    BC = N * C

    # Weights in the input dtype when bf16/f32 (the 2x taps 0.25/0.75 are
    # bf16-exact); accumulation inside the kernel is always f32.
    wdt = x.dtype if x.dtype in (jnp.bfloat16, jnp.float32) else jnp.float32
    wwt = jnp.asarray(_interp_matrix(W, Wout).T, dtype=wdt)      # (W, Wout)

    in_isz = jnp.dtype(x.dtype).itemsize
    out_isz = jnp.dtype(x.dtype).itemsize
    try:
        vmem_cap = int(pltpu.get_tpu_info().vmem_capacity_bytes)
    except Exception:  # conservative fallback (v7x-sized VMEM)
        vmem_cap = 64 * 1024 * 1024

    if planes_per_step is None:
        B = _choose_planes_per_step(BC, H, W, in_isz, out_isz, vmem_cap)
    else:
        B = planes_per_step
        assert BC % B == 0 and (B == BC or (B * H) % 8 == 0), (BC, B, H)
    G = BC // B
    BH = B * H

    # Zero-copy views: planes stacked along sublanes; output's last dim packs
    # (even row | odd row) so the kernel writes directly in NCHW layout.
    x2d = x.reshape(BC * H, W)

    kernel = functools.partial(_upsample2x_kernel, H=H, Wout=Wout)

    flops = 2 * BC * H * W * Wout + 8 * BC * Hout * Wout
    bytes_accessed = (BC * H * W * in_isz + BC * Hout * Wout * out_isz
                      + wwt.size * jnp.dtype(wdt).itemsize)

    block_vmem = BH * (_round_up(W, 128) * in_isz + _round_up(2 * Wout, 128) * out_isz)
    vmem_limit = int(min(vmem_cap * 3 // 4,
                         max(32 * 1024 * 1024, 2 * block_vmem + 4 * 1024 * 1024)))

    out2d = pl.pallas_call(
        kernel,
        out_shape=jax.ShapeDtypeStruct((BC * H, 2 * Wout), x.dtype),
        grid_spec=pltpu.PrefetchScalarGridSpec(
            num_scalar_prefetch=0,
            grid=(G,),
            in_specs=[
                pl.BlockSpec((BH, W), lambda i: (i, 0)),
                pl.BlockSpec((W, Wout), lambda i: (0, 0)),
            ],
            out_specs=pl.BlockSpec((BH, 2 * Wout), lambda i: (i, 0)),
        ),
        compiler_params=pltpu.CompilerParams(
            dimension_semantics=("parallel",),
            vmem_limit_bytes=vmem_limit,
        ),
        cost_estimate=pl.CostEstimate(
            flops=int(flops), transcendentals=0, bytes_accessed=int(bytes_accessed)),
    )(x2d, wwt)

    return out2d.reshape(N, C, Hout, Wout)


# --------------------------------------------------------------------------- #
# Pure-JAX reference (PyTorch bilinear, align_corners=False)
# --------------------------------------------------------------------------- #
def _reference_upsample_2x(x: jax.Array) -> jax.Array:
    N, C, H, W = x.shape
    wh = jnp.asarray(_interp_matrix(H, 2 * H))
    ww = jnp.asarray(_interp_matrix(W, 2 * W))
    return jnp.einsum("oh,nchw,pw->ncop", wh, x.astype(jnp.float32), ww)


if __name__ == "__main__":
    key = jax.random.PRNGKey(0)
    k1, k2, k3 = jax.random.split(key, 3)

    # 1) f32, mid-decoder-sized feature map.
    x = jax.random.normal(k1, (2, 4, 16, 16), dtype=jnp.float32)
    out = jax.block_until_ready(upsample_bilinear_2x(x))
    ref = _reference_upsample_2x(x)
    assert out.shape == (2, 4, 32, 32), out.shape
    np.testing.assert_allclose(np.asarray(out), np.asarray(ref), rtol=1e-4, atol=1e-5)

    # 2) Odd channel count: exercises divisor-based plane blocking (no padding).
    x2 = jax.random.normal(k2, (1, 3, 8, 8), dtype=jnp.float32)
    out2 = jax.block_until_ready(upsample_bilinear_2x(x2))
    ref2 = _reference_upsample_2x(x2)
    assert out2.shape == (1, 3, 16, 16), out2.shape
    np.testing.assert_allclose(np.asarray(out2), np.asarray(ref2), rtol=1e-4, atol=1e-5)

    # 3) bf16 end-to-end (halved HBM traffic) with a forced multi-step grid, so
    #    the pipelined path and per-plane roll clamping at block boundaries are
    #    exercised.  Tolerance reflects the single bf16 rounding at the store.
    x3 = jax.random.normal(k3, (2, 4, 16, 16), dtype=jnp.bfloat16)
    out3 = jax.block_until_ready(upsample_bilinear_2x(x3, planes_per_step=2))
    ref3 = _reference_upsample_2x(x3)
    assert out3.shape == (2, 4, 32, 32) and out3.dtype == jnp.bfloat16
    np.testing.assert_allclose(np.asarray(out3, dtype=np.float32), np.asarray(ref3),
                               rtol=2e-2, atol=2e-2)

    print("KERNEL_OK")
</pallas_src>

<mosaic_0001>
module attributes {stable_mosaic.version = 11 : i64} {
  func.func @_upsample2x_kernel(%arg0: i32, %arg1: memref<128x16xf32, #tpu.memory_space<vmem>>, %arg2: memref<16x32xf32, #tpu.memory_space<vmem>>, %arg3: memref<128x64xf32, #tpu.memory_space<vmem>>) attributes {dimension_semantics = [#tpu.dimension_semantics<parallel>], iteration_bounds = array<i64: 1>, scalar_prefetch = 0 : i64, scratch_operands = 0 : i64, tpu.core_type = #tpu.core_type<tc>, window_params = [{transform_indices = @transform_0, window_bounds = array<i64: 128, 16>}, {pipeline_mode = #tpu.pipeline_mode<synchronous>, transform_indices = @transform_1, window_bounds = array<i64: 16, 32>}, {transform_indices = @transform_2, window_bounds = array<i64: 128, 64>}]} {
    %c0 = arith.constant 0 : index
    %c0_0 = arith.constant 0 : index
    %0 = vector.load %arg1[%c0, %c0_0] : memref<128x16xf32, #tpu.memory_space<vmem>>, vector<128x16xf32>
    %c0_1 = arith.constant 0 : index
    %c0_2 = arith.constant 0 : index
    %1 = vector.load %arg2[%c0_1, %c0_2] : memref<16x32xf32, #tpu.memory_space<vmem>>, vector<16x32xf32>
    %cst = arith.constant dense<0.000000e+00> : vector<128x32xf32>
    %2 = tpu.matmul %0, %1, %cst {dimension_numbers = #tpu.dot_dimension_numbers<[1], [0], [0], [1], [0, 0, 1, 1], [], []>} : vector<128x16xf32>, vector<16x32xf32>, vector<128x32xf32> -> vector<128x32xf32>
    %c1_i32 = arith.constant 1 : i32
    %3 = tpu.dynamic_rotate %2 by %c1_i32 dim 0 : vector<128x32xf32>, i32 -> vector<128x32xf32>
    %c127_i32 = arith.constant 127 : i32
    %4 = tpu.dynamic_rotate %2 by %c127_i32 dim 0 : vector<128x32xf32>, i32 -> vector<128x32xf32>
    %5 = tpu.iota {dimensions = array<i32: 0>} : vector<128x1xi32>
    %c15_i32 = arith.constant 15 : i32
    %6 = vector.broadcast %c15_i32 : i32 to vector<128x1xi32>
    %7 = arith.andi %5, %6 : vector<128x1xi32>
    %c0_i32 = arith.constant 0 : i32
    %8 = vector.broadcast %c0_i32 : i32 to vector<128x1xi32>
    %9 = arith.cmpi eq, %7, %8 : vector<128x1xi32>
    %10 = vector.shape_cast %9 : vector<128x1xi1> to vector<128x1xi1>
    %11 = vector.broadcast %10 : vector<128x1xi1> to vector<128x32xi1>
    %12 = arith.select %11, %2, %3 : vector<128x32xi1>, vector<128x32xf32>
    %c15_i32_3 = arith.constant 15 : i32
    %13 = vector.broadcast %c15_i32_3 : i32 to vector<128x1xi32>
    %14 = arith.cmpi eq, %7, %13 : vector<128x1xi32>
    %15 = vector.shape_cast %14 : vector<128x1xi1> to vector<128x1xi1>
    %16 = vector.broadcast %15 : vector<128x1xi1> to vector<128x32xi1>
    %17 = arith.select %16, %2, %4 : vector<128x32xi1>, vector<128x32xf32>
    %cst_4 = arith.constant 7.500000e-01 : f32
    %18 = vector.broadcast %cst_4 : f32 to vector<128x32xf32>
    %19 = arith.mulf %18, %2 : vector<128x32xf32>
    %cst_5 = arith.constant 2.500000e-01 : f32
    %20 = vector.broadcast %cst_5 : f32 to vector<128x32xf32>
    %21 = arith.mulf %20, %12 : vector<128x32xf32>
    %22 = arith.addf %19, %21 : vector<128x32xf32>
    %cst_6 = arith.constant 7.500000e-01 : f32
    %23 = vector.broadcast %cst_6 : f32 to vector<128x32xf32>
    %24 = arith.mulf %23, %2 : vector<128x32xf32>
    %cst_7 = arith.constant 2.500000e-01 : f32
    %25 = vector.broadcast %cst_7 : f32 to vector<128x32xf32>
    %26 = arith.mulf %25, %17 : vector<128x32xf32>
    %27 = arith.addf %24, %26 : vector<128x32xf32>
    %c0_8 = arith.constant 0 : index
    %c0_9 = arith.constant 0 : index
    %28 = vector.load %arg3[%c0_8, %c0_9] : memref<128x64xf32, #tpu.memory_space<vmem>>, vector<128x32xf32>
    tpu.vector_store %arg3[%c0_8, %c0_9], %22 {strides = array<i32>} : memref<128x64xf32, #tpu.memory_space<vmem>>, vector<128x32xf32>,
    %c0_10 = arith.constant 0 : index
    %c32 = arith.constant 32 : index
    %29 = vector.load %arg3[%c0_10, %c32] : memref<128x64xf32, #tpu.memory_space<vmem>>, vector<128x32xf32>
    tpu.vector_store %arg3[%c0_10, %c32], %27 {strides = array<i32>} : memref<128x64xf32, #tpu.memory_space<vmem>>, vector<128x32xf32>,
    return
  }
  func.func @transform_0(%arg0: i32) -> (i32, i32) {
    %c0_i32 = arith.constant 0 : i32
    %c0_i32_0 = arith.constant 0 : i32
    return %arg0, %c0_i32 : i32, i32
  }
  func.func @transform_1(%arg0: i32) -> (i32, i32) {
    %c0_i32 = arith.constant 0 : i32
    %c0_i32_0 = arith.constant 0 : i32
    %c0_i32_1 = arith.constant 0 : i32
    return %c0_i32, %c0_i32_0 : i32, i32
  }
  func.func @transform_2(%arg0: i32) -> (i32, i32) {
    %c0_i32 = arith.constant 0 : i32
    %c0_i32_0 = arith.constant 0 : i32
    return %arg0, %c0_i32 : i32, i32
  }
}

</mosaic_0001>

<bundles_post_ra>
// kernel: tpu_custom_call.1
= control target key start
LH: loop header
LB: loop body
LE: loop exit
PB: predicated region body
PF: predicated region fallthrough
CT: control target
= control target key end

     0   :  { %vm29_vm0 = vcmask 130048   ;;  %v239_v19 = vlaneseq  ;;  %vm530_vm7 = vcmask 261120   ;;  %s701_s17 = smov 32   ;;  %s1441_s1 = inlined_call_operand.vmem [shape: f32[16,32], index: 1, kind: input, shape index: {}]   ;;  %s1442_s0 = inlined_call_operand.vmem [shape: f32[128,16], index: 0, kind: input, shape index: {}]   ;;  %s1443_s2 = inlined_call_operand.vmem [shape: f32[128,64], index: 2, kind: output, shape index: {}]  }
   0x1   :  { %v27_v0 = vld [vmem:[%s1441_s1] sm:$0xff]  ;;  %v28_v1 = vld [vmem:[%s1441_s1 + $0x8] sm:$0xff]  ;;  %v13_v7 = vld [vmem:[%s1442_s0 + $0x10] sm:$0xff] }
   0x2   :  { %v11_v2 = vld [vmem:[%s1442_s0] sm:$0xff]  ;;  %v694_v3 = vpack.c.bf16 %v28_v1, %v27_v0  ;;  %v12_v5 = vld [vmem:[%s1442_s0 + $0x8] sm:$0xff]  ;;  %v21_v8 = vld [vmem:[%s1442_s0 + $0x50] sm:$0xff]  ;;  %v787_v20 = vshrl.u32 %v239_v19, 7 }
   0x3   :  { %670 = vmatprep.mubr.msk.f32.mxu0 %vm29_vm0, %v11_v2  ;;  %v19_v4 = vld [vmem:[%s1442_s0 + $0x40] sm:$0xff]  ;;  %v20_v6 = vld [vmem:[%s1442_s0 + $0x48] sm:$0xff]  ;;  %v14_v9 = vld [vmem:[%s1442_s0 + $0x18] sm:$0xff] }
   0x4   :  { %682 = vmatprep.mubr.msk.f32.mxu1 %vm29_vm0, %v19_v4  ;;  %695 = vmatprep.subr.bf16.mxu0 %v694_v3  ;;  %v22_v10 = vld [vmem:[%s1442_s0 + $0x58] sm:$0xff]  ;;  %v15_v11 = vld [vmem:[%s1442_s0 + $0x20] sm:$0xff]  ;;  %v16_v13 = vld [vmem:[%s1442_s0 + $0x28] sm:$0xff]  ;;  %v292_v21 = vadd.s32 16, %v787_v20  ;;  %v300_v22 = vadd.s32 80, %v787_v20  ;;  %v302_v23 = vadd.s32 96, %v787_v20 }
   0x5   :  { %698 = vmatprep.subr.bf16.mxu1 %v694_v3  ;;  %697 = vmatpush3.bf16.msra.mxu0 %v694_v3  ;;  %v23_v12 = vld [vmem:[%s1442_s0 + $0x60] sm:$0xff]  ;;  %v24_v14 = vld [vmem:[%s1442_s0 + $0x68] sm:$0xff]  ;;  %v17_v15 = vld [vmem:[%s1442_s0 + $0x30] sm:$0xff]  ;;  %v294_v25 = vadd.s32 32, %v787_v20  ;;  %v794_v26 = vadd.s32 56, %v787_v20  ;;  %v797_v27 = vadd.s32 64, %v787_v20 }
   0x6   :  { %699 = vmatpush3.bf16.msra.mxu1 %v694_v3  ;;  %v25_v16 = vld [vmem:[%s1442_s0 + $0x70] sm:$0xff]  ;;  %v18_v17 = vld [vmem:[%s1442_s0 + $0x38] sm:$0xff]  ;;  %v308_v24 = vand.u32 15, %v292_v21  ;;  %v316_v28 = vand.u32 15, %v300_v22  ;;  %v800_v29 = vadd.s32 120, %v787_v20  ;;  %v803_v30 = vadd.s32 112, %v787_v20 }
   0x7   :  { %v26_v18 = vld [vmem:[%s1442_s0 + $0x78] sm:$0xff]  ;;  %v806_v31 = vadd.s32 72, %v787_v20  ;;  %v809_v32 = vadd.s32 48, %v787_v20  ;;  %v812_v33 = vadd.s32 8, %v787_v20  ;;  %v815_v34 = vadd.s32 24, %v787_v20 }
   0x8   :  { %671 = vmatmul.mubr.msk.f32.vlgmr.msra.gmra.mrb[0].mxu0 %vm29_vm0, %v12_v5  ;;  %v818_v35 = vadd.s32 88, %v787_v20  ;;  %vm241_vm1 = vcmp.lt.s32.totalorder %v787_v20, 1  ;;  %v318_v36 = vand.u32 15, %v302_v23  ;;  %vm274_vm2 = vcmp.lt.s32.totalorder %v787_v20, 7 }
   0x9   :  { %683 = vmatmul.mubr.msk.f32.vlgmr.msra.gmra.mrb[0].mxu1 %vm29_vm0, %v20_v6  ;;  %673 = vmatprep.mubr.msk.f32.mxu0 %vm29_vm0, %v13_v7  ;;  %v823_v37 = vadd.s32 40, %v787_v20  ;;  %v310_v38 = vand.u32 15, %v294_v25  ;;  %v313_v39 = vand.u32 15, %v794_v26  ;;  %v314_v40 = vand.u32 15, %v797_v27 }
   0xa   :  { %685 = vmatprep.mubr.msk.f32.mxu1 %vm29_vm0, %v21_v8  ;;  %v828_v41 = vadd.s32 104, %v787_v20  ;;  %vm830_vm3 = vcmp.eq.s32.totalorder %v308_v24, 0  ;;  %vm834_vm4 = vcmp.eq.s32.totalorder %v316_v28, 0  ;;  %v306_v44 = vand.u32 15, %v787_v20 }
   0xb   :  { %v321_v45 = vand.u32 15, %v800_v29  ;;  %v320_v46 = vand.u32 15, %v803_v30  ;;  %v312_v50 = vand.u32 15, %v809_v32  ;;  %vm902_vm5 = vcmp.eq.s32.totalorder %v318_v36, 0 }
   0xc   :  { %674 = vmatmul.mubr.msk.f32.gmra.mrb[2].mxu0 %vm29_vm0, %v14_v9  ;;  %vm913_vm6 = vcmp.eq.s32.totalorder %v310_v38, 0  ;;  %vm923_vm8 = vcmp.eq.s32.totalorder %v314_v40, 0  ;;  %vm935_vm9 = vcmp.eq.s32.totalorder %v313_v39, 15  ;;  %vm977_vm10 = vcmp.eq.s32.totalorder %v306_v44, 0 }
   0xd   :  { %686 = vmatmul.mubr.msk.f32.gmra.mrb[2].mxu1 %vm29_vm0, %v22_v10  ;;  %676 = vmatprep.mubr.msk.f32.mxu0 %vm29_vm0, %v15_v11  ;;  %vm995_vm11 = vcmp.eq.s32.totalorder %v321_v45, 15  ;;  %vm1001_vm12 = vcmp.eq.s32.totalorder %v320_v46, 0  ;;  %vm1056_vm13 = vcmp.eq.s32.totalorder %v312_v50, 0 }
   0xe   :  { %688 = vmatprep.mubr.msk.f32.mxu1 %vm29_vm0, %v23_v12 }
  0x10   :  { %677 = vmatmul.mubr.msk.f32.gmra.mrb[4].mxu0 %vm29_vm0, %v16_v13 }
  0x11   :  { %689 = vmatmul.mubr.msk.f32.gmra.mrb[4].mxu1 %vm29_vm0, %v24_v14  ;;  %679 = vmatprep.mubr.msk.f32.mxu0 %vm29_vm0, %v17_v15 }
  0x12   :  { %691 = vmatprep.mubr.msk.f32.mxu1 %vm29_vm0, %v25_v16 }
  0x14   :  { %680 = vmatmul.mubr.msk.f32.gmra.mrb[6].mxu0 %vm29_vm0, %v18_v17 }
  0x15   :  { %692 = vmatmul.mubr.msk.f32.gmra.mrb[6].mxu1 %vm29_vm0, %v26_v18 }
  0xdb   :  { %v842_v48 = vpop.f32.mrb[0].mxu0 }
  0xdc   :  { %v844_v49 = vpop.f32.mrb[0].mxu1  ;;  %v224_v54 = vrot.slane %v842_v48, 7  ;;  %v1444_v55 = vrot.slane %v842_v48, 1  ;;  %v853_v57 = vpop.f32.mrb[1].mxu0  ;;  %v859_v60 = vmul.f32 0.75, %v842_v48 }
  0xdd   :  { %v232_v56 = vrot.slane %v844_v49, 7  ;;  %v855_v58 = vpop.f32.mrb[1].mxu1  ;;  %v1447_v61 = vrot.slane %v853_v57, 7  ;;  %v1446_v62 = vrot.slane %v853_v57, 1  ;;  %v1445_v0 = vrot.slane %v844_v49, 1 }
  0xde   :  { %v866_v1 = vmul.f32 0.75, %v844_v49  ;;  %v231_v2 = vrot.slane %v855_v58, 7  ;;  %v1448_v3 = vrot.slane %v855_v58, 1  ;;  %v875_v5 = vmul.f32 0.75, %v855_v58 }
  0xdf   :  { %v256_v4 = vsel %vm241_vm1, %v1447_v61, %v224_v54  ;;  %v877_v6 = vpop.f32.mrb[2].mxu0  ;;  %v289_v8 = vsel %vm274_vm2, %v1446_v62, %v1444_v55  ;;  %v888_v9 = vmul.f32 0.75, %v853_v57 }
  0xe0   :  { %v879_v7 = vpop.f32.mrb[2].mxu1  ;;  %v890_v10 = vmul.f32 0.25, %v256_v4  ;;  %v248_v11 = vsel %vm241_vm1, %v231_v2, %v232_v56  ;;  %v226_v12 = vrot.slane %v877_v6, 7  ;;  %v898_v14 = vpop.f32.mrb[3].mxu0  ;;  %v909_v18 = vmul.f32 0.75, %v877_v6 }
  0xe1   :  { %v900_v15 = vpop.f32.mrb[3].mxu1  ;;  %v906_v17 = vmul.f32 0.25, %v248_v11  ;;  %v234_v19 = vrot.slane %v879_v7, 7  ;;  %v918_v23 = vmul.f32 0.75, %v879_v7  ;;  %v225_v24 = vrot.slane %v898_v14, 7 }
  0xe2   :  { %v233_v26 = vrot.slane %v900_v15, 7  ;;  %v929_v36 = vmul.f32 0.75, %v900_v15  ;;  %v498_v11 = vmul.f32 0.25, %v289_v8  ;;  %v945_v40 = vsel %vm274_vm2, %v1448_v3, %v1445_v0 }
  0xe3   :  { %v931_v38 = vpop.f32.mrb[4].mxu0  ;;  %v254_v28 = vsel %vm241_vm1, %v225_v24, %v226_v12  ;;  %v255_v8 = vsel %vm241_vm1, %v224_v54, %v225_v24  ;;  %v506_v50 = vmul.f32 0.25, %v945_v40 }
  0xe4   :  { %v933_v4 = vpop.f32.mrb[4].mxu1  ;;  %v246_v39 = vsel %vm241_vm1, %v233_v26, %v234_v19  ;;  %v247_v21 = vsel %vm241_vm1, %v232_v56, %v233_v26  ;;  %v959_v59 = vpop.f32.mrb[5].mxu0  ;;  %v372_v0 = vsel %vm830_vm3, %v898_v14, %v255_v8  ;;  %v964_v25 = vmul.f32 0.25, %v254_v28 }
  0xe5   :  { %v957_v63 = vpop.f32.mrb[5].mxu1  ;;  %v380_v54 = vsel %vm834_vm4, %v900_v15, %v247_v21  ;;  %v969_v24 = vmul.f32 0.25, %v246_v39  ;;  %v971_v13 = vmul.f32 0.25, %v372_v0  ;;  %v1449_v56 = vrot.slane %v931_v38, 7 }
  0xe6   :  { %1464 = vst [vmem:[#allocation2_spill] sm:$0xff] %v964_v25  ;;  %v476_v53 = vmul.f32 0.25, %v380_v54  ;;  %v982_v28 = vmul.f32 0.75, %v931_v38  ;;  %v236_v43 = vrot.slane %v933_v4, 7  ;;  %v987_v0 = vmul.f32 0.75, %v933_v4 }
  0xe7   :  { %1465 = vst [vmem:[#allocation3_spill] sm:$0xff] %v969_v24  ;;  %v989_v8 = vpop.f32.mrb[6].mxu0  ;;  %v235_v21 = vrot.slane %v957_v63, 7  ;;  %v1009_v61 = vmul.f32 0.75, %v957_v63  ;;  %v514_v52 = vadd.f32 %v498_v11, %v888_v9  ;;  %v227_v30 = vrot.slane %v959_v59, 7 }
  0xe8   :  { %v991_v39 = vpop.f32.mrb[6].mxu1  ;;  %v492_v26 = vadd.f32 %v476_v53, %v929_v36  ;;  %v1013_v45 = vpop.f32.mrb[7].mxu0  ;;  %v1019_v51 = vmul.f32 0.75, %v959_v59  ;;  %v230_v47 = vrot.slane %v989_v8, 7  ;;  %v1450_v3 = vrot.slane %v989_v8, 1 }
  0xe9   :  { %v1011_v29 = vpop.f32.mrb[7].mxu1  ;;  %v244_v53 = vsel %vm241_vm1, %v235_v21, %v236_v43  ;;  %v245_v62 = vsel %vm241_vm1, %v234_v19, %v235_v21  ;;  %563 = vrot.lane.b32.xlu0 %v514_v52, %s701_s17  ;;  %v252_v19 = vsel %vm241_vm1, %v227_v30, %v1449_v56  ;;  %v253_v21 = vsel %vm241_vm1, %v226_v12, %v227_v30 }
  0xea   :  { %541 = vst.msk [vmem:[%s1443_s2 + $0x50] sm:$0xff] %vm530_vm7, %v492_v26  ;;  %v382_v11 = vsel %vm902_vm5, %v957_v63, %v245_v62  ;;  %v1034_v46 = vmul.f32 0.25, %v244_v53  ;;  %v374_v62 = vsel %vm913_vm6, %v959_v59, %v253_v21  ;;  %v1048_v16 = vmul.f32 0.25, %v252_v19 }
  0xeb   :  { %v478_v26 = vmul.f32 0.25, %v382_v11  ;;  %v249_v52 = vsel %vm241_vm1, %v230_v47, %v231_v2  ;;  %v470_v56 = vmul.f32 0.25, %v374_v62  ;;  %v1476_v12 = vrot.slane %v855_v58, 1 }
  0xec   :  { %1472 = vst [vmem:[#allocation4_spill] sm:$0xff] %v1034_v46  ;;  %1473 = vst [vmem:[#allocation5_spill] sm:$0xff] %v1048_v16  ;;  %v378_v30 = vsel %vm923_vm8, %v855_v58, %v249_v52  ;;  %v1072_v2 = vmul.f32 0.75, %v989_v8  ;;  %v238_v19 = vrot.slane %v991_v39, 7  ;;  %v1477_v21 = vand.u32 15, %v806_v31 }
  0xed   :  { %v1066_v22 = vsel %vm274_vm2, %v1450_v3, %v1476_v12  ;;  %v494_v32 = vadd.f32 %v478_v26, %v1009_v61  ;;  %v1079_v11 = vmul.f32 0.25, %v378_v30  ;;  %v1480_v58 = vand.u32 15, %v812_v33 }
  0xee   :  { %vm1084_vm14 = vcmp.eq.s32.totalorder %v1477_v21, 15  ;;  %v486_v26 = vadd.f32 %v470_v56, %v1019_v51  ;;  %v1451_v52 = vrot.slane %v991_v39, 1  ;;  %v1097_v12 = vmul.f32 0.75, %v991_v39 }
  0xef   :  { %vm1090_vm15 = vcmp.eq.s32.totalorder %v1480_v58, 15  ;;  %v237_v30 = vrot.slane %v1011_v29, 7  ;;  %v1483_v31 = vand.u32 15, %v815_v34  ;;  %v1486_v33 = vrot.slane %v853_v57, 7  ;;  %543 = vst.msk [vmem:[%s1443_s2 + $0x60] sm:$0xff] %vm530_vm7, %v494_v32 }
  0xf0   :  { %v1112_v3 = vmul.f32 0.75, %v1011_v29  ;;  %v1487_v34 = vrot.slane %v853_v57, 1  ;;  %v1488_v32 = vand.u32 15, %v818_v35  ;;  %535 = vst.msk [vmem:[%s1443_s2 + $0x20] sm:$0xff] %vm530_vm7, %v486_v26  ;;  %v1492_v35 = vrot.slane %v933_v4, 1 }
  0xf1   :  { %vm1102_vm0 = vcmp.eq.s32.totalorder %v1483_v31, 15  ;;  %v257_v58 = vsel %vm241_vm1, %v238_v19, %v1486_v33  ;;  %v242_v40 = vsel %vm241_vm1, %v237_v30, %v238_v19  ;;  %v243_v56 = vsel %vm241_vm1, %v236_v43, %v237_v30 }
  0xf2   :  { %v1125_v31 = vsel %vm274_vm2, %v1451_v52, %v1487_v34  ;;  %v370_v33 = vsel %vm977_vm10, %v853_v57, %v257_v58  ;;  %vm1136_vm3 = vcmp.eq.s32.totalorder %v1488_v32, 15  ;;  %v1491_v43 = vrot.slane %v1011_v29, 1 }
  0xf3   :  { %v1148_v42 = vmul.f32 0.25, %v370_v33  ;;  %v384_v30 = vsel %vm1001_vm12, %v1011_v29, %v243_v56  ;;  %v481_v58 = vmul.f32 0.25, %v242_v40  ;;  %v522_v34 = vadd.f32 %v506_v50, %v875_v5 }
  0xf4   :  { %v1156_v19 = vsel %vm274_vm2, %v1492_v35, %v1491_v43  ;;  %v480_v26 = vmul.f32 0.25, %v384_v30  ;;  %v1493_v32 = vrot.slane %v877_v6, 1  ;;  %v1494_v33 = vrot.slane %v898_v14, 1 }
  0xf5   :  { %v1495_v52 = vand.u32 15, %v823_v37  ;;  %v1498_v54 = vand.u32 15, %v828_v41  ;;  %v452_v50 = vmul.f32 0.75, %v898_v14  ;;  %v229_v35 = vrot.slane %v1013_v45, 7  ;;  %579 = vrot.lane.b32.xlu0 %v522_v34, %s701_s17 }
  0xf6   :  { %v287_v57 = vsel %vm274_vm2, %v1494_v33, %v1493_v32  ;;  %v264_v30 = vrot.slane %v1013_v45, 1  ;;  %v496_v32 = vadd.f32 %v480_v26, %v1112_v3  ;;  %v497_v37 = vadd.f32 %v481_v58, %v1097_v12 }
  0xf7   :  { %vm1170_vm4 = vcmp.eq.s32.totalorder %v1495_v52, 15  ;;  %vm1176_vm5 = vcmp.eq.s32.totalorder %v1498_v54, 15  ;;  %v500_v40 = vmul.f32 0.25, %v287_v57  ;;  %v456_v52 = vmul.f32 0.75, %v1013_v45 }
  0xf8   :  { %v1501_v41 = vrot.slane %v879_v7, 1  ;;  %v1502_v33 = vrot.slane %v900_v15, 1  ;;  %v484_v16 = vadd.f32 %v971_v13, %v452_v50  ;;  %v250_v24 = vsel %vm241_vm1, %v229_v35, %v230_v47  ;;  %545 = vst.msk [vmem:[%s1443_s2 + $0x70] sm:$0xff] %vm530_vm7, %v496_v32  ;;  %546 = vst.msk [vmem:[%s1443_s2 + $0x78] sm:$0xff] %vm530_vm7, %v497_v37 }
  0xf9   :  { %v516_v57 = vadd.f32 %v500_v40, %v452_v50  ;;  %v1503_v26 = vrot.slane %v931_v38, 7  ;;  %v1504_v34 = vrot.slane %v931_v38, 1  ;;  %v473_v40 = vmul.f32 0.25, %v250_v24 }
  0xfa   :  { %v279_v54 = vsel %vm274_vm2, %v1502_v33, %v1501_v41  ;;  %v1505_v13 = vrot.slane %v900_v15, 1  ;;  %v1506_v53 = vrot.slane %v844_v49, 1  ;;  %v1508_v50 = vrot.slane %v842_v48, 1  ;;  %533 = vst.msk [vmem:[%s1443_s2 + $0x10] sm:$0xff] %vm530_vm7, %v484_v16 }
  0xfb   :  { %v251_v58 = vsel %vm241_vm1, %v1503_v26, %v229_v35  ;;  %v284_v25 = vsel %vm274_vm2, %v1504_v34, %v264_v30  ;;  %v508_v33 = vmul.f32 0.25, %v279_v54  ;;  %567 = vrot.lane.b32.xlu1 %v516_v57, %s701_s17  ;;  %v1509_v32 = vrot.slane %v959_v59, 1 }
  0xfc   :  { %v376_v41 = vsel %vm1056_vm13, %v1013_v45, %v251_v58  ;;  %v280_v24 = vsel %vm274_vm2, %v1506_v53, %v1505_v13  ;;  %v1507_v45 = vrot.slane %v898_v14, 1  ;;  %v1510_v37 = vrot.slane %v877_v6, 1 }
  0xfd   :  { %v472_v47 = vmul.f32 0.25, %v376_v41  ;;  %v489_v15 = vadd.f32 %v473_v40, %v1072_v2  ;;  %v524_v14 = vadd.f32 %v508_v33, %v929_v36  ;;  %v443_v57 = vsel %vm1084_vm14, %v844_v49, %v280_v24 }
  0xfe   :  { %v288_v35 = vsel %vm274_vm2, %v1508_v50, %v1507_v45  ;;  %v286_v54 = vsel %vm274_vm2, %v1510_v37, %v1509_v32  ;;  %v507_v34 = vmul.f32 0.25, %v443_v57  ;;  %v1511_v36 = vrot.slane %v957_v63, 1 }
  0xff   :  { %v435_v26 = vsel %vm1090_vm15, %v842_v48, %v288_v35  ;;  %v488_v58 = vadd.f32 %v472_v47, %v456_v52  ;;  %v437_v13 = vsel %vm1102_vm0, %v877_v6, %v286_v54  ;;  %583 = vrot.lane.b32.xlu0 %v524_v14, %s701_s17  ;;  %v1512_v40 = vrot.slane %v879_v7, 1  ;;  %538 = vst.msk [vmem:[%s1443_s2 + $0x38] sm:$0xff] %vm530_vm7, %v489_v15 }
 0x100   :  { %v499_v41 = vmul.f32 0.25, %v435_v26  ;;  %v501_v16 = vmul.f32 0.25, %v437_v13  ;;  %v1513_v62 = vrot.slane %v931_v38, 1  ;;  %v1514_v48 = vmov %v1509_v32 }
 0x101   :  { %v278_v49 = vsel %vm274_vm2, %v1512_v40, %v1511_v36  ;;  %v1515_v21 = vrot.slane %v933_v4, 1  ;;  %v1516_v6 = vmov %v1511_v36  ;;  %v523_v47 = vadd.f32 %v507_v34, %v866_v1  ;;  %537 = vst.msk [vmem:[%s1443_s2 + $0x30] sm:$0xff] %vm530_vm7, %v488_v58 }
 0x102   :  { %v285_v27 = vsel %vm274_vm2, %v1514_v48, %v1513_v62  ;;  %v515_v53 = vadd.f32 %v499_v41, %v859_v60  ;;  %v445_v59 = vsel %vm1136_vm3, %v879_v7, %v278_v49  ;;  %v517_v63 = vadd.f32 %v501_v16, %v909_v18 }
 0x103   :  { %v277_v33 = vsel %vm274_vm2, %v1516_v6, %v1515_v21  ;;  %v502_v24 = vmul.f32 0.25, %v285_v27  ;;  %v509_v45 = vmul.f32 0.25, %v445_v59  ;;  %v1517_v35 = vsel %vm935_vm9, %v989_v8, %v1066_v22  ;;  %581 = vrot.lane.b32.xlu1 %v523_v47, %s701_s17 }
 0x104   :  { %v510_v50 = vmul.f32 0.25, %v277_v33  ;;  %v505_v32 = vmul.f32 0.25, %v1517_v35  ;;  %v439_v46 = vsel %vm1170_vm4, %v931_v38, %v284_v25  ;;  %v1518_v37 = vrot.slane %v989_v8, 1  ;;  %565 = vrot.lane.b32.xlu0 %v515_v53, %s701_s17 }
 0x105   :  { %v518_v7 = vadd.f32 %v502_v24, %v1019_v51  ;;  %v447_v55 = vsel %vm1176_vm5, %v933_v4, %v1156_v19  ;;  %v525_v22 = vadd.f32 %v509_v45, %v918_v23  ;;  %v503_v43 = vmul.f32 0.25, %v439_v46 }
 0x106   :  { %v283_v54 = vsel %vm274_vm2, %v264_v30, %v1518_v37  ;;  %v526_v51 = vadd.f32 %v510_v50, %v1009_v61  ;;  %v521_v15 = vadd.f32 %v505_v32, %v1072_v2  ;;  %v511_v38 = vmul.f32 0.25, %v447_v55 }
 0x107   :  { %v504_v25 = vmul.f32 0.25, %v283_v54  ;;  %v1519_v8 = vrot.slane %v991_v39, 1  ;;  %v1520_v30 = vrot.slane %v1011_v29, 1  ;;  %v1521_v4 = vsel %vm995_vm11, %v991_v39, %v1125_v31  ;;  %569 = vrot.lane.b32.xlu1 %v517_v63, %s701_s17 }
 0x108   :  { %v513_v19 = vmul.f32 0.25, %v1521_v4  ;;  %v519_v61 = vadd.f32 %v503_v43, %v982_v28  ;;  %v482_v2 = vadd.f32 %v1148_v42, %v888_v9  ;;  %v490_v57 = vadd.f32 %v1079_v11, %v875_v5  ;;  %571 = vrot.lane.b32.xlu0 %v518_v7, %s701_s17  ;;  %v1522_v9 = vld [vmem:[#allocation2_spill] sm:$0xff]  ;;  %v1525_v42 = vld [vmem:[#allocation4_spill] sm:$0xff] }
 0x109   :  { %v275_v14 = vsel %vm274_vm2, %v1520_v30, %v1519_v8  ;;  %v520_v29 = vadd.f32 %v504_v25, %v456_v52  ;;  %v527_v20 = vadd.f32 %v511_v38, %v987_v0  ;;  %v491_v39 = vadd.f32 %v906_v17, %v866_v1  ;;  %v1523_v17 = vld [vmem:[#allocation3_spill] sm:$0xff] }
 0x10a   :  { %v512_v56 = vmul.f32 0.25, %v275_v14  ;;  %v529_v44 = vadd.f32 %v513_v19, %v1097_v12  ;;  %531 = vst.msk [vmem:[%s1443_s2] sm:$0xff] %vm530_vm7, %v482_v2  ;;  %539 = vst.msk [vmem:[%s1443_s2 + $0x40] sm:$0xff] %vm530_vm7, %v490_v57  ;;  %v483_v5 = vadd.f32 %v890_v10, %v859_v60  ;;  %v485_v1 = vadd.f32 %v1522_v9, %v909_v18 }
 0x10b   :  { %v493_v11 = vadd.f32 %v1523_v17, %v918_v23  ;;  %540 = vst.msk [vmem:[%s1443_s2 + $0x48] sm:$0xff] %vm530_vm7, %v491_v39  ;;  %v495_v52 = vadd.f32 %v1525_v42, %v987_v0  ;;  %585 = vrot.lane.b32.xlu1 %v525_v22, %s701_s17  ;;  %vm611_vm1 = vcmask 523520  }
 0x10c   :  { %v528_v31 = vadd.f32 %v512_v56, %v1112_v3  ;;  %v1524_v3 = vld [vmem:[#allocation5_spill] sm:$0xff]  ;;  %532 = vst.msk [vmem:[%s1443_s2 + $0x8] sm:$0xff] %vm530_vm7, %v483_v5  ;;  %534 = vst.msk [vmem:[%s1443_s2 + $0x18] sm:$0xff] %vm530_vm7, %v485_v1  ;;  %587 = vrot.lane.b32.xlu0 %v526_v51, %s701_s17 }
 0x10d   :  { %v487_v12 = vadd.f32 %v1524_v3, %v982_v28  ;;  %542 = vst.msk [vmem:[%s1443_s2 + $0x58] sm:$0xff] %vm530_vm7, %v493_v11  ;;  %544 = vst.msk [vmem:[%s1443_s2 + $0x68] sm:$0xff] %vm530_vm7, %v495_v52 }
 0x10f   :  { %536 = vst.msk [vmem:[%s1443_s2 + $0x28] sm:$0xff] %vm530_vm7, %v487_v12  ;;  %577 = vrot.lane.b32.xlu1 %v521_v15, %s701_s17 }
 0x110   :  { %575 = vrot.lane.b32.xlu0 %v520_v29, %s701_s17 }
 0x113   :  { %573 = vrot.lane.b32.xlu1 %v519_v61, %s701_s17 }
 0x114   :  { %591 = vrot.lane.b32.xlu0 %v528_v31, %s701_s17 }
 0x117   :  { %589 = vrot.lane.b32.xlu1 %v527_v20, %s701_s17 }
 0x11b   :  { %593 = vrot.lane.b32.xlu1 %v529_v44, %s701_s17 }
 0x15b   :  { %v564_v60 = vpop.permute.xlu0 %563 }
 0x15c   :  { %612 = vst.msk [vmem:[%s1443_s2] sm:$0xff] %vm611_vm1, %v564_v60 }
 0x167   :  { %v580_v10 = vpop.permute.xlu0 %579 }
 0x168   :  { %620 = vst.msk [vmem:[%s1443_s2 + $0x40] sm:$0xff] %vm611_vm1, %v580_v10 }
 0x16d   :  { %v568_v18 = vpop.permute.xlu1 %567 }
 0x16e   :  { %614 = vst.msk [vmem:[%s1443_s2 + $0x10] sm:$0xff] %vm611_vm1, %v568_v18 }
 0x171   :  { %v584_v23 = vpop.permute.xlu0 %583 }
 0x172   :  { %622 = vst.msk [vmem:[%s1443_s2 + $0x50] sm:$0xff] %vm611_vm1, %v584_v23 }
 0x175   :  { %v582_v28 = vpop.permute.xlu1 %581 }
 0x176   :  { %621 = vst.msk [vmem:[%s1443_s2 + $0x48] sm:$0xff] %vm611_vm1, %v582_v28  ;;  %v566_v0 = vpop.permute.xlu0 %565 }
 0x177   :  { %613 = vst.msk [vmem:[%s1443_s2 + $0x8] sm:$0xff] %vm611_vm1, %v566_v0 }
 0x179   :  { %v570_v26 = vpop.permute.xlu1 %569 }
 0x17a   :  { %615 = vst.msk [vmem:[%s1443_s2 + $0x18] sm:$0xff] %vm611_vm1, %v570_v26  ;;  %v572_v58 = vpop.permute.xlu0 %571 }
 0x17b   :  { %616 = vst.msk [vmem:[%s1443_s2 + $0x20] sm:$0xff] %vm611_vm1, %v572_v58 }
 0x17d   :  { %v586_v34 = vpop.permute.xlu1 %585 }
 0x17e   :  { %623 = vst.msk [vmem:[%s1443_s2 + $0x58] sm:$0xff] %vm611_vm1, %v586_v34  ;;  %v588_v41 = vpop.permute.xlu0 %587 }
 0x17f   :  { %624 = vst.msk [vmem:[%s1443_s2 + $0x60] sm:$0xff] %vm611_vm1, %v588_v41 }
 0x181   :  { %v578_v13 = vpop.permute.xlu1 %577 }
 0x182   :  { %619 = vst.msk [vmem:[%s1443_s2 + $0x38] sm:$0xff] %vm611_vm1, %v578_v13  ;;  %v576_v16 = vpop.permute.xlu0 %575 }
 0x183   :  { %618 = vst.msk [vmem:[%s1443_s2 + $0x30] sm:$0xff] %vm611_vm1, %v576_v16 }
 0x185   :  { %v574_v36 = vpop.permute.xlu1 %573 }
 0x186   :  { %617 = vst.msk [vmem:[%s1443_s2 + $0x28] sm:$0xff] %vm611_vm1, %v574_v36  ;;  %v592_v40 = vpop.permute.xlu0 %591 }
 0x187   :  { %626 = vst.msk [vmem:[%s1443_s2 + $0x70] sm:$0xff] %vm611_vm1, %v592_v40 }
 0x189   :  { %v590_v49 = vpop.permute.xlu1 %589 }
 0x18a   :  { %625 = vst.msk [vmem:[%s1443_s2 + $0x68] sm:$0xff] %vm611_vm1, %v590_v49 }
 0x18d   :  { %v594_v62 = vpop.permute.xlu1 %593 }
 0x18e   :  { %627 = vst.msk [vmem:[%s1443_s2 + $0x78] sm:$0xff] %vm611_vm1, %v594_v62 }

</bundles_post_ra>
